<compile_context>
chip_gen: v7x
topology: tpu7x:2x2x1
jax: 0.10.0
libtpu: 0.0.40
codegen_flags: <defaults>
</compile_context>

<pallas_src>
import functools
import math

import jax
import jax.numpy as jnp
from jax.experimental import pallas as pl
from jax.experimental.pallas import tpu as pltpu


# ----------------------------------------------------------------------------
# Kernel: pure per-sample broadcast multiply (memory-bound).
# ----------------------------------------------------------------------------
def _drop_path_kernel(scale_ref, x_ref, o_ref):
    # scale_ref: (B_t, 1) per-sample scale: 0.0 (dropped) or 1/keep_prob (kept)
    # x_ref / o_ref: (B_t, F_t) lane-dense tile
    s = scale_ref[...].astype(x_ref.dtype)  # keep bf16 math in bf16 on v6e/v7x
    o_ref[...] = x_ref[...] * s


# ----------------------------------------------------------------------------
# Tile-size selection (respects the (8, 128) block constraint and a VMEM
# budget small enough for every generation's default scoped VMEM limit).
# ----------------------------------------------------------------------------
def _pick_batch_tile(b: int) -> int:
    # Second-to-last block dim must be a multiple of 8 or equal the full dim.
    if b % 8 != 0:
        return b
    for cand in (256, 128, 64, 32, 16, 8):
        if cand <= b and b % cand == 0:
            return cand
    return b


def _pick_feat_tile(f: int, b_t: int, itemsize: int,
                    budget_bytes: int = 2 * 1024 * 1024) -> int:
    # Last block dim must be a multiple of 128 or equal the full dim.
    if f % 128 != 0:
        return f
    max_elems = max(128, budget_bytes // max(1, b_t * itemsize))
    t = min(f, (max_elems // 128) * 128)
    t = max(t, 128)
    # Largest multiple-of-128 divisor of f that is <= t (so the grid is exact).
    while t >= 128:
        if f % t == 0:
            return t
        t -= 128
    return f


# ----------------------------------------------------------------------------
# Wrapper (mirrors drop_path(x, drop_prob, training))
# ----------------------------------------------------------------------------
def drop_path(x, drop_prob: float = 0.0, training: bool = False, *, key=None):
    """Stochastic depth. x: (B, ...) any trailing shape, any float dtype."""
    if drop_prob == 0.0 or not training:
        return x
    assert 0.0 < drop_prob < 1.0
    if key is None:
        key = jax.random.PRNGKey(0)

    keep_prob = 1.0 - float(drop_prob)
    b = x.shape[0]
    f = int(math.prod(x.shape[1:])) if x.ndim > 1 else 1
    x2 = x.reshape(b, f)  # lane-dense flattened features

    # torch: floor(keep_prob + U[0,1)) == 1  <=>  U >= drop_prob
    u = jax.random.uniform(key, (b, 1), dtype=jnp.float32)
    scale = jnp.where(u >= jnp.float32(drop_prob),
                      jnp.float32(1.0 / keep_prob),
                      jnp.float32(0.0))  # (B, 1)

    b_t = _pick_batch_tile(b)
    f_t = _pick_feat_tile(f, b_t, jnp.dtype(x.dtype).itemsize)
    grid = (b // b_t, f // f_t)

    out = pl.pallas_call(
        _drop_path_kernel,
        out_shape=jax.ShapeDtypeStruct((b, f), x.dtype),
        grid=grid,
        in_specs=[
            pl.BlockSpec((b_t, 1), lambda i, j: (i, 0)),      # per-sample scale
            pl.BlockSpec((b_t, f_t), lambda i, j: (i, j)),    # x tile
        ],
        out_specs=pl.BlockSpec((b_t, f_t), lambda i, j: (i, j)),
        compiler_params=pltpu.CompilerParams(
            dimension_semantics=("parallel", "parallel")),
    )(scale, x2)
    return out.reshape(x.shape)


# ----------------------------------------------------------------------------
# Driver
# ----------------------------------------------------------------------------
if __name__ == "__main__":
    root = jax.random.PRNGKey(0)
    kx, kmask = jax.random.split(root)

    B, C, H, W = 2, 4, 16, 16
    x = jax.random.normal(kx, (B, C, H, W), dtype=jnp.float32)

    drop_prob = 0.25
    keep_prob = 1.0 - drop_prob

    fwd = jax.jit(functools.partial(drop_path, drop_prob=drop_prob, training=True))
    y = jax.block_until_ready(fwd(x, key=kmask))
    assert y.shape == x.shape
    assert y.dtype == x.dtype

    # Exact reference (same key, same uniform draw).
    u = jax.random.uniform(kmask, (B, 1), dtype=jnp.float32)
    keep = (u >= jnp.float32(drop_prob)).astype(jnp.float32)
    ref = (x / keep_prob) * keep.reshape(B, 1, 1, 1)
    assert bool(jnp.all(jnp.abs(y - ref) <= 1e-5 * (1.0 + jnp.abs(ref))))

    # Each sample is either fully dropped (all zeros) or scaled by 1/keep_prob.
    flat_y = y.reshape(B, -1)
    flat_s = (x / keep_prob).reshape(B, -1)
    row_zero = jnp.all(flat_y == 0.0, axis=1)
    row_kept = jnp.all(jnp.abs(flat_y - flat_s) <= 1e-5, axis=1)
    assert bool(jnp.all(row_zero | row_kept))

    # Identity fast-paths (no kernel launch): eval mode and drop_prob == 0.
    y_eval = drop_path(x, drop_prob, training=False)
    assert bool(jnp.all(y_eval == x))
    y_p0 = drop_path(x, 0.0, training=True)
    assert bool(jnp.all(y_p0 == x))

    print("KERNEL_OK")
</pallas_src>

<mosaic_0001>
module attributes {stable_mosaic.version = 11 : i64} {
  func.func @_drop_path_kernel(%arg0: i32, %arg1: i32, %arg2: memref<2x1xf32, #tpu.memory_space<vmem>>, %arg3: memref<2x1024xf32, #tpu.memory_space<vmem>>, %arg4: memref<2x1024xf32, #tpu.memory_space<vmem>>) attributes {dimension_semantics = [#tpu.dimension_semantics<parallel>, #tpu.dimension_semantics<parallel>], iteration_bounds = array<i64: 1, 1>, scalar_prefetch = 0 : i64, scratch_operands = 0 : i64, tpu.core_type = #tpu.core_type<tc>, window_params = [{transform_indices = @transform_0, window_bounds = array<i64: 2, 1>}, {transform_indices = @transform_1, window_bounds = array<i64: 2, 1024>}, {transform_indices = @transform_2, window_bounds = array<i64: 2, 1024>}]} {
    %c0 = arith.constant 0 : index
    %c0_0 = arith.constant 0 : index
    %0 = vector.load %arg2[%c0, %c0_0] : memref<2x1xf32, #tpu.memory_space<vmem>>, vector<2x1xf32>
    %c0_1 = arith.constant 0 : index
    %c0_2 = arith.constant 0 : index
    %1 = vector.load %arg3[%c0_1, %c0_2] : memref<2x1024xf32, #tpu.memory_space<vmem>>, vector<2x1024xf32>
    %2 = vector.broadcast %0 : vector<2x1xf32> to vector<2x1024xf32>
    %3 = arith.mulf %1, %2 : vector<2x1024xf32>
    %c0_3 = arith.constant 0 : index
    %c0_4 = arith.constant 0 : index
    %4 = vector.load %arg4[%c0_3, %c0_4] : memref<2x1024xf32, #tpu.memory_space<vmem>>, vector<2x1024xf32>
    tpu.vector_store %arg4[%c0_3, %c0_4], %3 {strides = array<i32>} : memref<2x1024xf32, #tpu.memory_space<vmem>>, vector<2x1024xf32>,
    return
  }
  func.func @transform_0(%arg0: i32, %arg1: i32) -> (i32, i32) {
    %c0_i32 = arith.constant 0 : i32
    %c0_i32_0 = arith.constant 0 : i32
    return %arg0, %c0_i32 : i32, i32
  }
  func.func @transform_1(%arg0: i32, %arg1: i32) -> (i32, i32) {
    %c0_i32 = arith.constant 0 : i32
    return %arg0, %arg1 : i32, i32
  }
  func.func @transform_2(%arg0: i32, %arg1: i32) -> (i32, i32) {
    %c0_i32 = arith.constant 0 : i32
    return %arg0, %arg1 : i32, i32
  }
}

</mosaic_0001>

<bundles_post_ra>
// kernel: drop_path.1
= control target key start
LH: loop header
LB: loop body
LE: loop exit
PB: predicated region body
PF: predicated region fallthrough
CT: control target
= control target key end

     0   :  { %v37_v0 = vmov 0   ;;  %v38_v2 = vmov 269488144   ;;  %v21_v4 = vlaneseq  ;;  %s69_s0 = inlined_call_operand.vmem [shape: f32[2,1], index: 0, kind: input, shape index: {}]   ;;  %s70_s1 = inlined_call_operand.vmem [shape: f32[2,1024], index: 1, kind: input, shape index: {}]   ;;  %s71_s2 = inlined_call_operand.vmem [shape: f32[2,1024], index: 2, kind: output, shape index: {}]  }
   0x1   :  { %36 = vset.pattern.permute.xlu0 %v37_v0  ;;  %v11_v1 = vld [vmem:[%s69_s0] sm:$0x3]  ;;  %v19_v3 = vunpack.c.l.s4 %v38_v2  ;;  %v13_v9 = vld [vmem:[%s70_s1 + $0x8] sm:$0xff] }
   0x2   :  { %16 = vperm.xlu0 %36, %v11_v1   ;;  %v22_v6 = vshrl.u32 %v21_v4, 7  ;;  %v12_v8 = vld [vmem:[%s70_s1] sm:$0xff] }
   0x3   :  { %v20_v5 = vunpack.c.0.s8 %v19_v3 }
   0x5   :  { %v23_v7 = vsub.s32 %v20_v5, %v22_v6 }
  0x81   :  { %v17_v10 = vpop.permute.xlu0 %16 }
  0x82   :  { %v24_v11 = vrot.slane %v17_v10, %v23_v7 }
  0x84   :  { %v26_v12 = vmul.f32 %v24_v11, %v12_v8  ;;  %v27_v13 = vmul.f32 %v24_v11, %v13_v9 }
  0x86   :  { %28 = vst [vmem:[%s71_s2] sm:$0xff] %v26_v12  ;;  %29 = vst [vmem:[%s71_s2 + $0x8] sm:$0xff] %v27_v13 }

</bundles_post_ra>
